<compile_context>
chip_gen: v7x
topology: tpu7x:2x2x1
jax: 0.10.0
libtpu: 0.0.40
codegen_flags: <defaults>
</compile_context>

<pallas_src>
import functools

import jax
import jax.numpy as jnp
from jax.experimental import pallas as pl
from jax.experimental.pallas import tpu as pltpu


def _layernorm_kernel(x_ref, gamma_ref, beta_ref, o_ref, *, eps, hidden, padded, approx):
    x = x_ref[...].astype(jnp.float32)                      # (tile_rows, Hp)
    inv_h = 1.0 / float(hidden)

    # Padded lanes (if any) are zero in the wrapper, so the sum over Hp equals the sum
    # over the logical H; divide by the logical H, not the padded width.
    mean = jnp.sum(x, axis=-1, keepdims=True) * inv_h       # (tile_rows, 1)
    centered = x - mean                                     # reused for the output below

    if padded:
        # Exclude padded lanes from the variance (centered there is -mean, not data).
        lane = jax.lax.broadcasted_iota(jnp.int32, (1, x.shape[-1]), 1)
        c_var = jnp.where(lane < hidden, centered, 0.0)
    else:
        c_var = centered
    var = jnp.sum(c_var * c_var, axis=-1, keepdims=True) * inv_h   # unbiased=False
    std = jnp.sqrt(var)

    d = std + eps
    # One reciprocal per row; approx=True pushes it onto the otherwise-idle EUP slot.
    inv = pl.reciprocal(d, approx=approx)                   # (tile_rows, 1)
    if approx:
        # One Newton-Raphson refinement on the tiny per-row column -> near-f32 accuracy
        # at negligible VPU cost (kernel is HBM-bound on the element stream).
        inv = inv * (2.0 - d * inv)

    # gamma/beta are already f32 and zero-padded in the padded lanes, so padded output
    # lanes come out as 0 and are sliced off in the wrapper.
    out = (centered * inv) * gamma_ref[...] + beta_ref[...]
    o_ref[...] = out.astype(o_ref.dtype)


def _vmem_capacity_bytes():
    """Per-TensorCore VMEM budget: reported capacity clamped to 64 MiB.

    v7x has 64 MiB per TC (half of v5e/v6e); a chip-level report must not oversubscribe
    it, and 64 MiB is already more than enough for the <=1024-row tiles used below.
    """
    cap = 128 * 1024 * 1024
    try:
        info = pltpu.get_tpu_info()
        reported = int(getattr(info, "vmem_capacity_bytes", 0) or 0)
        if reported > 0:
            cap = reported
    except Exception:
        pass
    return min(cap, 64 * 1024 * 1024)


def _pick_tile_rows(rows, hidden_padded, dtype, budget_bytes):
    """Largest dtype-aligned row tile that (a) fits the VMEM budget, (b) stays <= 1024,
    and (c) leaves enough grid depth for pipelining / the v7x 2-TC split."""
    itemsize = jnp.dtype(dtype).itemsize
    sublane = max(8, 32 // itemsize)            # 8 (f32) / 16 (bf16) / 32 (int8, fp8)
    # Per-row bytes: input + output, each double-buffered, plus ~2 live f32 temporaries.
    per_row = hidden_padded * (2 * 2 * itemsize + 2 * 4)
    tile = min(budget_bytes // max(per_row, 1), 1024)       # 1024-row cap (roofline knee)
    # Keep >= ~16 grid steps (>= 8 per TensorCore on v7x) when rows are large enough;
    # tiny workloads fall through to a single step, which is fine.
    depth_cap = rows // 16
    if depth_cap >= sublane:
        tile = min(tile, depth_cap)
    tile = max(sublane, (tile // sublane) * sublane)        # whole packed vregs along sublanes
    rows_rounded = ((rows + sublane - 1) // sublane) * sublane
    return min(tile, rows_rounded)


def layer_norm(x, gamma, beta, eps=1e-6, tile_rows=None,
               approx_reciprocal=True, input_buffers=2):
    """x: (..., H). Normalizes over the last axis, matching the PyTorch module."""
    orig_shape = x.shape
    H = orig_shape[-1]
    Hp = ((H + 127) // 128) * 128               # lane-dense width (multiple of 128)
    padded = Hp != H

    x2 = x.reshape(-1, H)                       # (rows, H); hidden on the lane axis
    rows = x2.shape[0]

    # Cast / reshape params once here instead of per grid step inside the kernel.
    gamma2 = gamma.reshape(1, H).astype(jnp.float32)
    beta2 = beta.reshape(1, H).astype(jnp.float32)
    if padded:
        # Zero padding: keeps sums over the lane axis equal to the logical sums, and
        # (gamma=0, beta=0) makes the padded output lanes exactly zero.
        x2 = jnp.pad(x2, ((0, 0), (0, Hp - H)))
        gamma2 = jnp.pad(gamma2, ((0, 0), (0, Hp - H)))
        beta2 = jnp.pad(beta2, ((0, 0), (0, Hp - H)))

    vmem_cap = _vmem_capacity_bytes()
    if tile_rows is None:
        tile_rows = _pick_tile_rows(rows, Hp, x2.dtype, vmem_cap // 2)

    grid = (pl.cdiv(rows, tile_rows),)          # partial last block is masked by Pallas

    kernel = functools.partial(
        _layernorm_kernel,
        eps=float(eps), hidden=int(H), padded=bool(padded), approx=bool(approx_reciprocal),
    )

    # Optional deeper input buffering (only if profiling shows exposed DMA).
    x_spec_kwargs = {}
    if input_buffers is not None and int(input_buffers) > 2:
        x_spec_kwargs = dict(pipeline_mode=pl.Buffered(int(input_buffers)))

    out = pl.pallas_call(
        kernel,
        out_shape=jax.ShapeDtypeStruct((rows, Hp), x.dtype),
        grid_spec=pltpu.PrefetchScalarGridSpec(
            num_scalar_prefetch=0,
            grid=grid,
            in_specs=[
                pl.BlockSpec((tile_rows, Hp), lambda i: (i, 0), **x_spec_kwargs),
                pl.BlockSpec((1, Hp), lambda i: (0, 0)),   # gamma: resident
                pl.BlockSpec((1, Hp), lambda i: (0, 0)),   # beta: resident
            ],
            out_specs=pl.BlockSpec((tile_rows, Hp), lambda i: (i, 0)),
        ),
        compiler_params=pltpu.CompilerParams(
            dimension_semantics=("parallel",),                       # 2-TC sharding on v7x
            vmem_limit_bytes=min((vmem_cap * 3) // 4, 48 * 1024 * 1024),
        ),
    )(x2, gamma2, beta2)

    if padded:
        out = out[:, :H]
    return out.reshape(orig_shape)


if __name__ == "__main__":
    key = jax.random.PRNGKey(0)
    batch, seq, hidden = 2, 8, 32

    x = jax.random.normal(key, (batch, seq, hidden), dtype=jnp.float32)

    # Deterministic parameter init matching the module's __init__:
    #   gamma = ones(dimension), beta = zeros(dimension)
    gamma = jnp.ones((hidden,), dtype=jnp.float32)
    beta = jnp.zeros((hidden,), dtype=jnp.float32)
    eps = 1e-6

    def reference(t, g, b):
        mean = jnp.mean(t, axis=-1, keepdims=True)
        std = jnp.sqrt(jnp.mean((t - mean) ** 2, axis=-1, keepdims=True))
        return g * (t - mean) / (std + eps) + b

    ref = reference(x, gamma, beta)

    # 1) Exact path (full-precision reciprocal) — tight tolerance vs. reference.
    out_exact = jax.block_until_ready(
        layer_norm(x, gamma, beta, eps=eps, approx_reciprocal=False))
    assert out_exact.shape == x.shape
    assert jnp.allclose(out_exact, ref, atol=1e-5, rtol=1e-5), "exact-path mismatch"

    # 2) Fast path (EUP approximate reciprocal + one Newton step) — near-f32 accuracy.
    out_fast = jax.block_until_ready(
        layer_norm(x, gamma, beta, eps=eps, approx_reciprocal=True))
    assert jnp.allclose(out_fast, ref, atol=1e-4, rtol=1e-4), "approx-path mismatch"

    # 3) Row count not divisible by the tile: exercises cdiv + masked last block.
    x_odd = jax.random.normal(jax.random.PRNGKey(1), (3, 5, hidden), dtype=jnp.float32)
    out_odd = jax.block_until_ready(
        layer_norm(x_odd, gamma, beta, eps=eps, approx_reciprocal=False))
    assert out_odd.shape == x_odd.shape
    assert jnp.allclose(out_odd, reference(x_odd, gamma, beta),
                        atol=1e-5, rtol=1e-5), "ragged-rows mismatch"

    # 4) H already a multiple of 128: exercises the unpadded, lane-dense branch.
    h128 = 128
    x128 = jax.random.normal(jax.random.PRNGKey(2), (2, 8, h128), dtype=jnp.float32)
    g128 = jnp.ones((h128,), dtype=jnp.float32)
    b128 = jnp.zeros((h128,), dtype=jnp.float32)
    out128 = jax.block_until_ready(
        layer_norm(x128, g128, b128, eps=eps, approx_reciprocal=False))
    assert jnp.allclose(out128, reference(x128, g128, b128),
                        atol=1e-5, rtol=1e-5), "H=128 mismatch"

    print("KERNEL_OK")
</pallas_src>

<mosaic_0001>
module attributes {stable_mosaic.version = 11 : i64} {
  func.func @_layernorm_kernel(%arg0: i32, %arg1: memref<16x128xf32, #tpu.memory_space<vmem>>, %arg2: memref<1x128xf32, #tpu.memory_space<vmem>>, %arg3: memref<1x128xf32, #tpu.memory_space<vmem>>, %arg4: memref<16x128xf32, #tpu.memory_space<vmem>>) attributes {dimension_semantics = [#tpu.dimension_semantics<parallel>], iteration_bounds = array<i64: 1>, scalar_prefetch = 0 : i64, scratch_operands = 0 : i64, tpu.core_type = #tpu.core_type<tc>, window_params = [{transform_indices = @transform_0, window_bounds = array<i64: 16, 128>}, {pipeline_mode = #tpu.pipeline_mode<synchronous>, transform_indices = @transform_1, window_bounds = array<i64: 1, 128>}, {pipeline_mode = #tpu.pipeline_mode<synchronous>, transform_indices = @transform_2, window_bounds = array<i64: 1, 128>}, {transform_indices = @transform_3, window_bounds = array<i64: 16, 128>}]} {
    %c0 = arith.constant 0 : index
    %c0_0 = arith.constant 0 : index
    %0 = vector.load %arg1[%c0, %c0_0] : memref<16x128xf32, #tpu.memory_space<vmem>>, vector<16x128xf32>
    %cst = arith.constant dense<0.000000e+00> : vector<16xf32>
    %1 = vector.multi_reduction <add>, %0, %cst [1] : vector<16x128xf32> to vector<16xf32>
    %2 = vector.shape_cast %1 : vector<16xf32> to vector<16x1xf32>
    %cst_1 = arith.constant 3.125000e-02 : f32
    %3 = vector.broadcast %cst_1 : f32 to vector<16x1xf32>
    %4 = arith.mulf %2, %3 : vector<16x1xf32>
    %5 = vector.broadcast %4 : vector<16x1xf32> to vector<16x128xf32>
    %6 = arith.subf %0, %5 : vector<16x128xf32>
    %7 = tpu.iota {dimensions = array<i32: 1>} : vector<1x128xi32>
    %c32_i32 = arith.constant 32 : i32
    %8 = vector.broadcast %c32_i32 : i32 to vector<1x128xi32>
    %9 = arith.cmpi slt, %7, %8 : vector<1x128xi32>
    %cst_2 = arith.constant 0.000000e+00 : f32
    %10 = vector.shape_cast %9 : vector<1x128xi1> to vector<1x128xi1>
    %11 = vector.broadcast %10 : vector<1x128xi1> to vector<16x128xi1>
    %12 = vector.broadcast %cst_2 : f32 to vector<16x128xf32>
    %13 = arith.select %11, %6, %12 : vector<16x128xi1>, vector<16x128xf32>
    %14 = arith.mulf %13, %13 : vector<16x128xf32>
    %cst_3 = arith.constant dense<0.000000e+00> : vector<16xf32>
    %15 = vector.multi_reduction <add>, %14, %cst_3 [1] : vector<16x128xf32> to vector<16xf32>
    %16 = vector.shape_cast %15 : vector<16xf32> to vector<16x1xf32>
    %cst_4 = arith.constant 3.125000e-02 : f32
    %17 = vector.broadcast %cst_4 : f32 to vector<16x1xf32>
    %18 = arith.mulf %16, %17 : vector<16x1xf32>
    %19 = math.sqrt %18 : vector<16x1xf32>
    %cst_5 = arith.constant 9.99999997E-7 : f32
    %20 = vector.broadcast %cst_5 : f32 to vector<16x1xf32>
    %21 = arith.addf %19, %20 : vector<16x1xf32>
    %22 = tpu.reciprocal %21 : vector<16x1xf32> -> vector<16x1xf32>
    %23 = vector.broadcast %22 : vector<16x1xf32> to vector<16x128xf32>
    %24 = arith.mulf %6, %23 : vector<16x128xf32>
    %c0_6 = arith.constant 0 : index
    %c0_7 = arith.constant 0 : index
    %25 = vector.load %arg2[%c0_6, %c0_7] : memref<1x128xf32, #tpu.memory_space<vmem>>, vector<1x128xf32>
    %26 = vector.broadcast %25 : vector<1x128xf32> to vector<16x128xf32>
    %27 = arith.mulf %24, %26 : vector<16x128xf32>
    %c0_8 = arith.constant 0 : index
    %c0_9 = arith.constant 0 : index
    %28 = vector.load %arg3[%c0_8, %c0_9] : memref<1x128xf32, #tpu.memory_space<vmem>>, vector<1x128xf32>
    %29 = vector.broadcast %28 : vector<1x128xf32> to vector<16x128xf32>
    %30 = arith.addf %27, %29 : vector<16x128xf32>
    %c0_10 = arith.constant 0 : index
    %c0_11 = arith.constant 0 : index
    %31 = vector.load %arg4[%c0_10, %c0_11] : memref<16x128xf32, #tpu.memory_space<vmem>>, vector<16x128xf32>
    tpu.vector_store %arg4[%c0_10, %c0_11], %30 {strides = array<i32>} : memref<16x128xf32, #tpu.memory_space<vmem>>, vector<16x128xf32>,
    return
  }
  func.func @transform_0(%arg0: i32) -> (i32, i32) {
    %c0_i32 = arith.constant 0 : i32
    %c0_i32_0 = arith.constant 0 : i32
    return %arg0, %c0_i32 : i32, i32
  }
  func.func @transform_1(%arg0: i32) -> (i32, i32) {
    %c0_i32 = arith.constant 0 : i32
    %c0_i32_0 = arith.constant 0 : i32
    %c0_i32_1 = arith.constant 0 : i32
    return %c0_i32, %c0_i32_0 : i32, i32
  }
  func.func @transform_2(%arg0: i32) -> (i32, i32) {
    %c0_i32 = arith.constant 0 : i32
    %c0_i32_0 = arith.constant 0 : i32
    %c0_i32_1 = arith.constant 0 : i32
    return %c0_i32, %c0_i32_0 : i32, i32
  }
  func.func @transform_3(%arg0: i32) -> (i32, i32) {
    %c0_i32 = arith.constant 0 : i32
    %c0_i32_0 = arith.constant 0 : i32
    return %arg0, %c0_i32 : i32, i32
  }
}

</mosaic_0001>

<bundles_post_ra>
// kernel: tpu_custom_call.1
= control target key start
LH: loop header
LB: loop body
LE: loop exit
PB: predicated region body
PF: predicated region fallthrough
CT: control target
= control target key end

     0   :  { %8 = vsyncpa [#allocation3], 0  ;;  %s233_s0 = inlined_call_operand.hbm [shape: f32[16,128], index: 0, kind: input, shape index: {}]   ;;  %s234_s1 = inlined_call_operand.vmem [shape: f32[1,128], index: 1, kind: input, shape index: {}]   ;;  %s235_s2 = inlined_call_operand.vmem [shape: f32[1,128], index: 2, kind: input, shape index: {}]   ;;  %s236_s3 = inlined_call_operand.hbm [shape: f32[16,128], index: 3, kind: output, shape index: {}]  }
   0x1   :  { %9 = vsyncpa [#allocation4], 0  ;;  %s173_s12 = smov [#allocation2]   ;;  %s125_s16 = scalar_lea.hbm %s233_s0, 256 }
   0x2   :  { %s15_s13 = sshll.u32 %s173_s12, 4  ;;  %p126_p0 = scmp.ne.s32.totalorder %s233_s0, %s125_s16  ;;  %s16_s13 = int_to_ptr.vmem [resolvable:$true] %s15_s13 }
   0x3   :  { %p129_p1 = scmp.lt.u32.totalorder %s125_s16, %s233_s0 }
   0x5   :  { %p131_p2 = pnand %p129_p1, %p126_p0 }
   0x7   :  { %134 = shalt.err (!%p131_p2)
}
   0x8   :  { %s135_s21 = scalar_lea.vmem %s16_s13, 256  ;;  %p140_p4 = scmp.lt.s32.totalorder %s16_s13, %s16_s13 }
   0x9   :  { %p136_p3 = scmp.ne.s32.totalorder %s16_s13, %s135_s21  ;;  %p141_p5 = scmp.lt.s32.totalorder %s135_s21, %s135_s21 }
   0xb   :  { %p142_p6 = por %p141_p5, %p140_p4 }
   0xd   :  { %p143_p7 = pnand %p142_p6, %p136_p3 }
   0xf   :  { %146 = shalt.err (!%p143_p7)
}
  0x10   :  { %s174_s22 = smov 128   ;;  %s175_s23 = smov 8  }
  0x11   :  { %21 = dma.hbm_to_vmem [thread:$0]  %s233_s0, 256, %s16_s13, [#allocation3], %s174_s22, %s174_s22, %s175_s23  }
  0x12   :  { %169 = dma.done.wait [#allocation3], 256  }
  0x13   :  { %170 = vsyncadd [#allocation3], 4294967040  ;;  %v29_v0 = vld [vmem:[#allocation2] sm:$0xff]  ;;  %v30_v1 = vld [vmem:[#allocation2 + $0x8] sm:$0xff]  ;;  %v39_v2 = vlaneseq  ;;  %s176_s29 = smov [#allocation5]  }
  0x14   :  { %31 = vadd.xlane.f32.xlu0 %v29_v0  ;;  %v111_v31 = vld [vmem:[%s234_s1] ss:$0 sm:$0xff]  ;;  %s99_s30 = sshll.u32 %s176_s29, 4  ;;  %s100_s30 = int_to_ptr.vmem [resolvable:$true] %s99_s30 }
  0x15   :  { %v40_v3 = vand.u32 127, %v39_v2  ;;  %v112_v33 = vld [vmem:[%s235_s2] ss:$0 sm:$0xff]  ;;  %s147_s4 = scalar_lea.vmem %s100_s30, 256  ;;  %p152_p9 = scmp.lt.s32.totalorder %s100_s30, %s100_s30 }
  0x16   :  { %p148_p8 = scmp.ne.s32.totalorder %s100_s30, %s147_s4  ;;  %p153_p10 = scmp.lt.s32.totalorder %s147_s4, %s147_s4 }
  0x17   :  { %vm41_vm0 = vcmp.lt.s32.totalorder %v40_v3, 32 }
  0x18   :  { %33 = vadd.xlane.f32.xlu0 %v30_v1  ;;  %p154_p11 = por %p153_p10, %p152_p9 }
  0x1a   :  { %p155_p12 = pnand %p154_p11, %p148_p8 }
  0xa1   :  { %v32_v4 = vpop.xlane.xlu0 %31 }
  0xa2   :  { %v35_v5 = vmul.f32 0.03125, %v32_v4 }
  0xa4   :  { %v37_v6 = vsub.f32 %v29_v0, %v35_v5 }
  0xa5   :  { %v34_v7 = vpop.xlane.xlu0 %33 }
  0xa6   :  { %v36_v8 = vmul.f32 0.03125, %v34_v7  ;;  %v44_v9 = vsel %vm41_vm0, %v37_v6, 0.0 }
  0xa7   :  { %v46_v10 = vmul.f32 %v44_v9, %v44_v9 }
  0xa8   :  { %v38_v11 = vsub.f32 %v30_v1, %v36_v8 }
  0xa9   :  { %48 = vadd.xlane.f32.xlu1 %v46_v10 }
  0xaa   :  { %v45_v12 = vsel %vm41_vm0, %v38_v11, 0.0 }
  0xab   :  { %v47_v13 = vmul.f32 %v45_v12, %v45_v12 }
  0xad   :  { %50 = vadd.xlane.f32.xlu1 %v47_v13 }
 0x136   :  { %v49_v14 = vpop.xlane.xlu1 %48 }
 0x137   :  { %v52_v15 = vmul.f32 0.03125, %v49_v14 }
 0x139   :  { %117 = vrsqrt.f32 %v52_v15  ;;  %vm56_vm1 = vcmp.eq.f32.partialorder %v52_v15, inf  ;;  %v59_v20 = vand.u32 2147483648, %v52_v15  ;;  %vm58_vm2 = vcmp.eq.f32.partialorder %v52_v15, 0.0 }
 0x13a   :  { %v51_v16 = vpop.xlane.xlu1 %50 }
 0x13b   :  { %v53_v17 = vmul.f32 0.03125, %v51_v16 }
 0x13d   :  { %119 = vrsqrt.f32 %v53_v17  ;;  %vm63_vm3 = vcmp.eq.f32.partialorder %v53_v17, inf  ;;  %v66_v26 = vand.u32 2147483648, %v53_v17  ;;  %vm65_vm4 = vcmp.eq.f32.partialorder %v53_v17, 0.0 }
 0x143   :  { %v118_v18 = vpop.eup %117 }
 0x144   :  { %v55_v19 = vmul.f32 %v118_v18, %v52_v15 }
 0x146   :  { %v57_v21 = vsel %vm56_vm1, %v52_v15, %v55_v19 }
 0x147   :  { %v120_v22 = vpop.eup %119  ;;  %v60_v23 = vsel %vm58_vm2, %v59_v20, %v57_v21 }
 0x148   :  { %v62_v24 = vmul.f32 %v120_v22, %v53_v17  ;;  %v68_v25 = vadd.f32 1e-06, %v60_v23 }
 0x14a   :  { %v64_v27 = vsel %vm63_vm3, %v53_v17, %v62_v24  ;;  %121 = vrcp.f32 %v68_v25 }
 0x14b   :  { %v67_v28 = vsel %vm65_vm4, %v66_v26, %v64_v27 }
 0x14c   :  { %v69_v29 = vadd.f32 1e-06, %v67_v28 }
 0x14e   :  { %123 = vrcp.f32 %v69_v29 }
 0x154   :  { %v122_v30 = vpop.eup %121 }
 0x155   :  { %v72_v32 = vmul.f32 %v122_v30, %v37_v6 }
 0x157   :  { %v81_v34 = vmul.f32 %v111_v31, %v72_v32 }
 0x158   :  { %v124_v35 = vpop.eup %123 }
 0x159   :  { %v73_v36 = vmul.f32 %v124_v35, %v38_v11  ;;  %v90_v37 = vadd.f32 %v112_v33, %v81_v34 }
 0x15b   :  { %v82_v38 = vmul.f32 %v111_v31, %v73_v36  ;;  %92 = vst [vmem:[#allocation5] sm:$0xff] %v90_v37 }
 0x15d   :  { %v91_v39 = vadd.f32 %v112_v33, %v82_v38 }
 0x15f   :  { %93 = vst [vmem:[#allocation5 + $0x8] sm:$0xff] %v91_v39 }
 0x160   :  { %158 = shalt.err (!%p155_p12)
}
 0x161   :  { %s159_s5 = scalar_lea.hbm %s236_s3, 256 }
 0x162   :  { %p160_p13 = scmp.ne.s32.totalorder %s236_s3, %s159_s5  ;;  %p163_p0 = scmp.lt.u32.totalorder %s159_s5, %s236_s3 }
 0x164   :  { %p165_p1 = pnand %p163_p0, %p160_p13 }
 0x166   :  { %168 = shalt.err (!%p165_p1)
}
 0x167   :  { %105 = dma.vmem_to_hbm [thread:$0]  %s100_s30, 256, %s236_s3, [#allocation4], %s174_s22, %s174_s22, %s175_s23  }
 0x168   :  { %171 = dma.done.wait [#allocation4], 256  }
 0x169   :  { %172 = vsyncadd [#allocation4], 4294967040 }
 0x16a   :  { %109 = vsyncpa [#allocation3], 1 }
 0x16b   :  { %110 = vsyncpa [#allocation4], 1 }

</bundles_post_ra>
